<compile_context>
chip_gen: v7x
topology: tpu7x:2x2x1
jax: 0.10.0
libtpu: 0.0.40
codegen_flags: <defaults>
</compile_context>

<pallas_src>
import jax
import jax.numpy as jnp
from jax.experimental import pallas as pl
from jax.experimental.pallas import tpu as pltpu


def _round_up(x, m):
    return (x + m - 1) // m * m


def _sae_kernel(x_ref, we_ref, be_ref, wd_ref, bd_ref, recon_ref, z_ref, acc_ref):
    l = pl.program_id(1)

    # Encoder tile: z = relu(x @ W_enc_t[:, lTL:(l+1)TL] + b_enc_tile).
    # Weights are pre-transposed in the wrapper -> no in-kernel transpose.
    z = jnp.dot(x_ref[...], we_ref[...], preferred_element_type=jnp.float32)
    z = jnp.maximum(z + be_ref[...].astype(jnp.float32), 0.0)
    z_ref[...] = z.astype(z_ref.dtype)

    # Decoder: reduce over latent tiles into a VMEM f32 accumulator.
    # Bias is fused into the accumulator initialization at l == 0.
    @pl.when(l == 0)
    def _():
        acc_ref[...] = jnp.broadcast_to(
            bd_ref[...].astype(jnp.float32), acc_ref.shape
        )

    acc_ref[...] += jnp.dot(
        z.astype(wd_ref.dtype), wd_ref[...], preferred_element_type=jnp.float32
    )

    @pl.when(l == pl.num_programs(1) - 1)
    def _():
        recon_ref[...] = acc_ref[...].astype(recon_ref.dtype)


def sparse_autoencoder_linear(x, w_enc, b_enc, w_dec, b_dec, compute_dtype=None):
    """PyTorch nn.Linear convention parameters:
         w_enc [latent, input], b_enc [latent], w_dec [hidden, latent], b_dec [hidden]
       x: [B, input_dim].  Returns (recon [B, hidden_dim], z [B, latent_dim]).
       compute_dtype: optionally cast matmul operands (e.g. jnp.bfloat16);
       accumulation / bias / ReLU stay f32; outputs keep x.dtype."""
    B, input_dim = x.shape
    latent_dim = w_enc.shape[0]
    hidden_dim = w_dec.shape[0]
    out_dtype = x.dtype
    op_dtype = compute_dtype if compute_dtype is not None else x.dtype

    # ---- alignment / tiling -------------------------------------------------
    in_p = _round_up(input_dim, 128)
    hid_p = _round_up(hidden_dim, 128)
    TL = min(_round_up(latent_dim, 128), 512)   # latent (contraction) tile
    lat_p = _round_up(latent_dim, TL)

    TB = min(_round_up(B, 8), 128)              # batch tile
    b_p = _round_up(B, TB)

    # ---- one-time layout plumbing in the wrapper (pad + pre-transpose) ------
    xp = jnp.zeros((b_p, in_p), op_dtype).at[:B, :input_dim].set(x.astype(op_dtype))
    we_t = jnp.zeros((in_p, lat_p), op_dtype).at[:input_dim, :latent_dim].set(
        w_enc.T.astype(op_dtype))
    wd_t = jnp.zeros((lat_p, hid_p), op_dtype).at[:latent_dim, :hidden_dim].set(
        w_dec.T.astype(op_dtype))
    be2 = jnp.zeros((1, lat_p), jnp.float32).at[0, :latent_dim].set(
        b_enc.astype(jnp.float32))
    bd2 = jnp.zeros((1, hid_p), jnp.float32).at[0, :hidden_dim].set(
        b_dec.astype(jnp.float32))

    grid = (b_p // TB, lat_p // TL)

    recon_p, z_p = pl.pallas_call(
        _sae_kernel,
        out_shape=(
            jax.ShapeDtypeStruct((b_p, hid_p), out_dtype),
            jax.ShapeDtypeStruct((b_p, lat_p), out_dtype),
        ),
        grid=grid,
        in_specs=[
            # x tile: constant across the latent axis -> stays VMEM-resident.
            pl.BlockSpec((TB, in_p), lambda i, l: (i, 0)),
            # W_enc^T tile: independent of the batch index.
            pl.BlockSpec((in_p, TL), lambda i, l: (0, l)),
            pl.BlockSpec((1, TL), lambda i, l: (0, l)),
            # W_dec^T tile: independent of the batch index.
            pl.BlockSpec((TL, hid_p), lambda i, l: (l, 0)),
            pl.BlockSpec((1, hid_p), lambda i, l: (0, 0)),
        ],
        out_specs=(
            # recon: same block across the latent axis -> accumulator output.
            pl.BlockSpec((TB, hid_p), lambda i, l: (i, 0)),
            pl.BlockSpec((TB, TL), lambda i, l: (i, l)),
        ),
        scratch_shapes=[pltpu.VMEM((TB, hid_p), jnp.float32)],
        compiler_params=pltpu.CompilerParams(
            dimension_semantics=("parallel", "arbitrary"),
            vmem_limit_bytes=64 << 20,
        ),
    )(xp, we_t, be2, wd_t, bd2)

    # TODO(synk): for very large input/hidden dims (>~8K), additionally tile
    # the input (encoder contraction) and hidden axes on the grid.
    return recon_p[:B, :hidden_dim], z_p[:B, :latent_dim]


def _reference(x, w_enc, b_enc, w_dec, b_dec):
    z = jnp.maximum(x @ w_enc.T + b_enc, 0.0)
    recon = z @ w_dec.T + b_dec
    return recon, z


if __name__ == "__main__":
    # Small, module-consistent shapes.
    B, input_dim, hidden_dim, latent_dim = 8, 64, 64, 32

    key = jax.random.PRNGKey(0)
    k_x, k_we, k_be, k_wd, k_bd = jax.random.split(key, 5)

    x = jax.random.normal(k_x, (B, input_dim), dtype=jnp.float32)

    # Deterministic parameter init (uniform, like PyTorch Linear's 1/sqrt(fan_in)).
    bound_e = 1.0 / jnp.sqrt(input_dim)
    bound_d = 1.0 / jnp.sqrt(latent_dim)
    w_enc = jax.random.uniform(k_we, (latent_dim, input_dim), jnp.float32, -bound_e, bound_e)
    b_enc = jax.random.uniform(k_be, (latent_dim,), jnp.float32, -bound_e, bound_e)
    w_dec = jax.random.uniform(k_wd, (hidden_dim, latent_dim), jnp.float32, -bound_d, bound_d)
    b_dec = jax.random.uniform(k_bd, (hidden_dim,), jnp.float32, -bound_d, bound_d)

    recon, z = sparse_autoencoder_linear(x, w_enc, b_enc, w_dec, b_dec)
    jax.block_until_ready((recon, z))

    recon_ref, z_ref = _reference(x, w_enc, b_enc, w_dec, b_dec)
    assert recon.shape == (B, hidden_dim) and z.shape == (B, latent_dim)
    assert jnp.allclose(recon, recon_ref, atol=1e-5, rtol=1e-5)
    assert jnp.allclose(z, z_ref, atol=1e-5, rtol=1e-5)

    print("KERNEL_OK")
</pallas_src>

<mosaic_0001>
module attributes {stable_mosaic.version = 11 : i64} {
  func.func @_sae_kernel(%arg0: i32, %arg1: i32, %arg2: memref<8x128xf32, #tpu.memory_space<vmem>>, %arg3: memref<128x128xf32, #tpu.memory_space<vmem>>, %arg4: memref<1x128xf32, #tpu.memory_space<vmem>>, %arg5: memref<128x128xf32, #tpu.memory_space<vmem>>, %arg6: memref<1x128xf32, #tpu.memory_space<vmem>>, %arg7: memref<8x128xf32, #tpu.memory_space<vmem>>, %arg8: memref<8x128xf32, #tpu.memory_space<vmem>>, %arg9: memref<8x128xf32, #tpu.memory_space<vmem>>) attributes {dimension_semantics = [#tpu.dimension_semantics<parallel>, #tpu.dimension_semantics<arbitrary>], iteration_bounds = array<i64: 1, 1>, scalar_prefetch = 0 : i64, scratch_operands = 1 : i64, tpu.core_type = #tpu.core_type<tc>, window_params = [{transform_indices = @transform_0, window_bounds = array<i64: 8, 128>}, {transform_indices = @transform_1, window_bounds = array<i64: 128, 128>}, {transform_indices = @transform_2, window_bounds = array<i64: 1, 128>}, {transform_indices = @transform_3, window_bounds = array<i64: 128, 128>}, {pipeline_mode = #tpu.pipeline_mode<synchronous>, transform_indices = @transform_4, window_bounds = array<i64: 1, 128>}, {transform_indices = @transform_5, window_bounds = array<i64: 8, 128>}, {transform_indices = @transform_6, window_bounds = array<i64: 8, 128>}]} {
    %c0 = arith.constant 0 : index
    %c0_0 = arith.constant 0 : index
    %0 = vector.load %arg2[%c0, %c0_0] : memref<8x128xf32, #tpu.memory_space<vmem>>, vector<8x128xf32>
    %c0_1 = arith.constant 0 : index
    %c0_2 = arith.constant 0 : index
    %1 = vector.load %arg3[%c0_1, %c0_2] : memref<128x128xf32, #tpu.memory_space<vmem>>, vector<128x128xf32>
    %cst = arith.constant dense<0.000000e+00> : vector<8x128xf32>
    %2 = tpu.matmul %0, %1, %cst {dimension_numbers = #tpu.dot_dimension_numbers<[1], [0], [0], [1], [0, 0, 1, 1], [], []>} : vector<8x128xf32>, vector<128x128xf32>, vector<8x128xf32> -> vector<8x128xf32>
    %c0_3 = arith.constant 0 : index
    %c0_4 = arith.constant 0 : index
    %3 = vector.load %arg4[%c0_3, %c0_4] : memref<1x128xf32, #tpu.memory_space<vmem>>, vector<1x128xf32>
    %4 = vector.broadcast %3 : vector<1x128xf32> to vector<8x128xf32>
    %5 = arith.addf %2, %4 : vector<8x128xf32>
    %cst_5 = arith.constant 0.000000e+00 : f32
    %6 = vector.broadcast %cst_5 : f32 to vector<8x128xf32>
    %7 = arith.maximumf %5, %6 : vector<8x128xf32>
    %c0_6 = arith.constant 0 : index
    %c0_7 = arith.constant 0 : index
    %8 = vector.load %arg8[%c0_6, %c0_7] : memref<8x128xf32, #tpu.memory_space<vmem>>, vector<8x128xf32>
    tpu.vector_store %arg8[%c0_6, %c0_7], %7 {strides = array<i32>} : memref<8x128xf32, #tpu.memory_space<vmem>>, vector<8x128xf32>,
    %c0_i32 = arith.constant 0 : i32
    %9 = arith.cmpi eq, %arg1, %c0_i32 : i32
    %10 = arith.extui %9 : i1 to i32
    %c0_i32_8 = arith.constant 0 : i32
    %11 = arith.cmpi ne, %10, %c0_i32_8 : i32
    scf.if %11 {
      %c0_18 = arith.constant 0 : index
      %c0_19 = arith.constant 0 : index
      %20 = vector.load %arg6[%c0_18, %c0_19] : memref<1x128xf32, #tpu.memory_space<vmem>>, vector<1x128xf32>
      %21 = vector.shape_cast %20 : vector<1x128xf32> to vector<1x128xf32>
      %22 = vector.broadcast %21 : vector<1x128xf32> to vector<8x128xf32>
      %c0_20 = arith.constant 0 : index
      %c0_21 = arith.constant 0 : index
      %23 = vector.load %arg9[%c0_20, %c0_21] : memref<8x128xf32, #tpu.memory_space<vmem>>, vector<8x128xf32>
      tpu.vector_store %arg9[%c0_20, %c0_21], %22 {strides = array<i32>} : memref<8x128xf32, #tpu.memory_space<vmem>>, vector<8x128xf32>,
    } else {
    }
    %c0_9 = arith.constant 0 : index
    %c0_10 = arith.constant 0 : index
    %12 = vector.load %arg9[%c0_9, %c0_10] : memref<8x128xf32, #tpu.memory_space<vmem>>, vector<8x128xf32>
    %c0_11 = arith.constant 0 : index
    %c0_12 = arith.constant 0 : index
    %13 = vector.load %arg5[%c0_11, %c0_12] : memref<128x128xf32, #tpu.memory_space<vmem>>, vector<128x128xf32>
    %cst_13 = arith.constant dense<0.000000e+00> : vector<8x128xf32>
    %14 = tpu.matmul %7, %13, %cst_13 {dimension_numbers = #tpu.dot_dimension_numbers<[1], [0], [0], [1], [0, 0, 1, 1], [], []>} : vector<8x128xf32>, vector<128x128xf32>, vector<8x128xf32> -> vector<8x128xf32>
    %15 = arith.addf %12, %14 : vector<8x128xf32>
    %c0_14 = arith.constant 0 : index
    %c0_15 = arith.constant 0 : index
    %16 = vector.load %arg9[%c0_14, %c0_15] : memref<8x128xf32, #tpu.memory_space<vmem>>, vector<8x128xf32>
    tpu.vector_store %arg9[%c0_14, %c0_15], %15 {strides = array<i32>} : memref<8x128xf32, #tpu.memory_space<vmem>>, vector<8x128xf32>,
    %c0_i32_16 = arith.constant 0 : i32
    %17 = arith.cmpi eq, %arg1, %c0_i32_16 : i32
    %18 = arith.extui %17 : i1 to i32
    %c0_i32_17 = arith.constant 0 : i32
    %19 = arith.cmpi ne, %18, %c0_i32_17 : i32
    scf.if %19 {
      %c0_18 = arith.constant 0 : index
      %c0_19 = arith.constant 0 : index
      %20 = vector.load %arg9[%c0_18, %c0_19] : memref<8x128xf32, #tpu.memory_space<vmem>>, vector<8x128xf32>
      %c0_20 = arith.constant 0 : index
      %c0_21 = arith.constant 0 : index
      %21 = vector.load %arg7[%c0_20, %c0_21] : memref<8x128xf32, #tpu.memory_space<vmem>>, vector<8x128xf32>
      tpu.vector_store %arg7[%c0_20, %c0_21], %20 {strides = array<i32>} : memref<8x128xf32, #tpu.memory_space<vmem>>, vector<8x128xf32>,
    } else {
    }
    return
  }
  func.func @transform_0(%arg0: i32, %arg1: i32) -> (i32, i32) {
    %c0_i32 = arith.constant 0 : i32
    %c0_i32_0 = arith.constant 0 : i32
    return %arg0, %c0_i32 : i32, i32
  }
  func.func @transform_1(%arg0: i32, %arg1: i32) -> (i32, i32) {
    %c0_i32 = arith.constant 0 : i32
    %c0_i32_0 = arith.constant 0 : i32
    return %c0_i32, %arg1 : i32, i32
  }
  func.func @transform_2(%arg0: i32, %arg1: i32) -> (i32, i32) {
    %c0_i32 = arith.constant 0 : i32
    %c0_i32_0 = arith.constant 0 : i32
    return %c0_i32, %arg1 : i32, i32
  }
  func.func @transform_3(%arg0: i32, %arg1: i32) -> (i32, i32) {
    %c0_i32 = arith.constant 0 : i32
    %c0_i32_0 = arith.constant 0 : i32
    return %arg1, %c0_i32 : i32, i32
  }
  func.func @transform_4(%arg0: i32, %arg1: i32) -> (i32, i32) {
    %c0_i32 = arith.constant 0 : i32
    %c0_i32_0 = arith.constant 0 : i32
    %c0_i32_1 = arith.constant 0 : i32
    return %c0_i32, %c0_i32_0 : i32, i32
  }
  func.func @transform_5(%arg0: i32, %arg1: i32) -> (i32, i32) {
    %c0_i32 = arith.constant 0 : i32
    %c0_i32_0 = arith.constant 0 : i32
    return %arg0, %c0_i32 : i32, i32
  }
  func.func @transform_6(%arg0: i32, %arg1: i32) -> (i32, i32) {
    %c0_i32 = arith.constant 0 : i32
    return %arg0, %arg1 : i32, i32
  }
}

</mosaic_0001>

<bundles_post_ra>
// kernel: tpu_custom_call.1
= control target key start
LH: loop header
LB: loop body
LE: loop exit
PB: predicated region body
PF: predicated region fallthrough
CT: control target
= control target key end

     0   :  { %12 = vsyncpa [#allocation4], 0  ;;  %s796_s0 = inlined_call_operand.hbm [shape: f32[8,128], index: 0, kind: input, shape index: {}]   ;;  %s797_s1 = inlined_call_operand.hbm [shape: f32[128,128], index: 1, kind: input, shape index: {}]   ;;  %s798_s2 = inlined_call_operand.hbm [shape: f32[1,128], index: 2, kind: input, shape index: {}]   ;;  %s799_s3 = inlined_call_operand.hbm [shape: f32[128,128], index: 3, kind: input, shape index: {}]   ;;  %s800_s4 = inlined_call_operand.hbm [shape: f32[1,128], index: 4, kind: input, shape index: {}]   ;;  %s801_s5 = inlined_call_operand.hbm [shape: f32[8,128], index: 5, kind: output, shape index: {0}]   ;;  %s802_s6 = inlined_call_operand.hbm [shape: f32[8,128], index: 6, kind: output, shape index: {1}]  }
   0x1   :  { %13 = vsyncpa [#allocation7], 0 }
   0x2   :  { %14 = vsyncpa [#allocation10], 0 }
   0x3   :  { %15 = vsyncpa [#allocation5], 0 }
   0x4   :  { %16 = vsyncpa [#allocation14], 0  ;;  %s649_s21 = smov [#allocation6]   ;;  %s485_s25 = scalar_lea.hbm %s797_s1, 2048 }
   0x5   :  { %s32_s22 = sshll.u32 %s649_s21, 4  ;;  %p486_p0 = scmp.ne.s32.totalorder %s797_s1, %s485_s25  ;;  %s33_s22 = int_to_ptr.vmem [resolvable:$true] %s32_s22 }
   0x6   :  { %p489_p1 = scmp.lt.u32.totalorder %s485_s25, %s797_s1 }
   0x8   :  { %p491_p2 = pnand %p489_p1, %p486_p0 }
   0xa   :  { %494 = shalt.err (!%p491_p2)
}
   0xb   :  { %s495_s30 = scalar_lea.vmem %s33_s22, 2048  ;;  %p500_p4 = scmp.lt.s32.totalorder %s33_s22, %s33_s22 }
   0xc   :  { %p496_p3 = scmp.ne.s32.totalorder %s33_s22, %s495_s30  ;;  %p501_p5 = scmp.lt.s32.totalorder %s495_s30, %s495_s30 }
   0xe   :  { %p502_p6 = por %p501_p5, %p500_p4 }
  0x10   :  { %p503_p7 = pnand %p502_p6, %p496_p3 }
  0x12   :  { %506 = shalt.err (!%p503_p7)
}
  0x13   :  { %s650_s7 = smov 128   ;;  %s651_s8 = smov 8  }
  0x14   :  { %38 = dma.hbm_to_vmem [thread:$0]  %s797_s1, 2048, %s33_s22, [#allocation7], %s650_s7, %s650_s7, %s651_s8  }
  0x15   :  { %s652_s11 = smov [#allocation9]   ;;  %s653_s13 = smov [#allocation3]  }
  0x16   :  { %s54_s12 = sshll.u32 %s652_s11, 4  ;;  %s23_s14 = sshll.u32 %s653_s13, 4  ;;  %s55_s12 = int_to_ptr.vmem [resolvable:$true] %s54_s12  ;;  %s24_s14 = int_to_ptr.vmem [resolvable:$true] %s23_s14 }
  0x17   :  { %s507_s17 = scalar_lea.hbm %s799_s3, 2048 }
  0x18   :  { %p508_p8 = scmp.ne.s32.totalorder %s799_s3, %s507_s17  ;;  %p511_p9 = scmp.lt.u32.totalorder %s507_s17, %s799_s3 }
  0x1a   :  { %p513_p10 = pnand %p511_p9, %p508_p8 }
  0x1c   :  { %516 = shalt.err (!%p513_p10)
}
  0x1d   :  { %s517_s1 = scalar_lea.vmem %s55_s12, 2048  ;;  %p522_p12 = scmp.lt.s32.totalorder %s55_s12, %s55_s12 }
  0x1e   :  { %p518_p11 = scmp.ne.s32.totalorder %s55_s12, %s517_s1  ;;  %p523_p13 = scmp.lt.s32.totalorder %s517_s1, %s517_s1 }
  0x20   :  { %p524_p0 = por %p523_p13, %p522_p12 }
  0x22   :  { %p525_p1 = pnand %p524_p0, %p518_p11 }
  0x24   :  { %528 = shalt.err (!%p525_p1)
}
  0x25   :  { %60 = dma.hbm_to_vmem [thread:$0]  %s799_s3, 2048, %s55_s12, [#allocation10], %s650_s7, %s650_s7, %s651_s8  }
  0x26   :  { %s529_s26 = scalar_lea.hbm %s796_s0, 128 }
  0x27   :  { %p530_p2 = scmp.ne.s32.totalorder %s796_s0, %s529_s26  ;;  %p533_p3 = scmp.lt.u32.totalorder %s529_s26, %s796_s0 }
  0x29   :  { %p535_p4 = pnand %p533_p3, %p530_p2 }
  0x2b   :  { %538 = shalt.err (!%p535_p4)
}
  0x2c   :  { %s539_s9 = scalar_lea.vmem %s24_s14, 128  ;;  %p544_p6 = scmp.lt.s32.totalorder %s24_s14, %s24_s14 }
  0x2d   :  { %p540_p5 = scmp.ne.s32.totalorder %s24_s14, %s539_s9  ;;  %p545_p7 = scmp.lt.s32.totalorder %s539_s9, %s539_s9 }
  0x2f   :  { %p546_p8 = por %p545_p7, %p544_p6 }
  0x31   :  { %p547_p9 = pnand %p546_p8, %p540_p5 }
  0x33   :  { %550 = shalt.err (!%p547_p9)
}
  0x34   :  { %26 = dma.hbm_to_vmem [thread:$0]  %s796_s0, 128, %s24_s14, [#allocation4]  }
  0x35   :  { %s654_s8 = smov [#allocation8]   ;;  %s655_s11 = smov [#allocation11]  }
  0x36   :  { %s45_s10 = sshll.u32 %s654_s8, 4  ;;  %s67_s12 = sshll.u32 %s655_s11, 4  ;;  %s46_s10 = int_to_ptr.vmem [resolvable:$true] %s45_s10  ;;  %s68_s12 = int_to_ptr.vmem [resolvable:$true] %s67_s12 }
  0x37   :  { %s551_s16 = scalar_lea.hbm %s798_s2, 16 }
  0x38   :  { %p552_p10 = scmp.ne.s32.totalorder %s798_s2, %s551_s16  ;;  %p555_p11 = scmp.lt.u32.totalorder %s551_s16, %s798_s2 }
  0x3a   :  { %p557_p12 = pnand %p555_p11, %p552_p10 }
  0x3c   :  { %560 = shalt.err (!%p557_p12)
}
  0x3d   :  { %s561_s0 = scalar_lea.vmem %s46_s10, 16  ;;  %s565_s14 = scalar_lea.vmem %s46_s10, 32 }
  0x3e   :  { %p562_p13 = scmp.ne.s32.totalorder %s46_s10, %s561_s0  ;;  %p566_p0 = scmp.lt.s32.totalorder %s46_s10, %s46_s10 }
  0x3f   :  { %p567_p1 = scmp.lt.s32.totalorder %s565_s14, %s561_s0 }
  0x41   :  { %p568_p2 = por %p567_p1, %p566_p0 }
  0x43   :  { %p569_p3 = pnand %p568_p2, %p562_p13 }
  0x45   :  { %572 = shalt.err (!%p569_p3)
}
  0x46   :  { %48 = dma.hbm_to_vmem [thread:$0]  %s798_s2, 16, %s46_s10, [#allocation7]  }
  0x47   :  { %s573_s24 = scalar_lea.hbm %s800_s4, 16 }
  0x48   :  { %p574_p4 = scmp.ne.s32.totalorder %s800_s4, %s573_s24  ;;  %p577_p5 = scmp.lt.u32.totalorder %s573_s24, %s800_s4 }
  0x4a   :  { %p579_p6 = pnand %p577_p5, %p574_p4 }
  0x4c   :  { %582 = shalt.err (!%p579_p6)
}
  0x4d   :  { %s583_s29 = scalar_lea.vmem %s68_s12, 16  ;;  %s587_s30 = scalar_lea.vmem %s68_s12, 32 }
  0x4e   :  { %p584_p7 = scmp.ne.s32.totalorder %s68_s12, %s583_s29  ;;  %p588_p8 = scmp.lt.s32.totalorder %s68_s12, %s68_s12 }
  0x4f   :  { %p589_p9 = scmp.lt.s32.totalorder %s587_s30, %s583_s29 }
  0x51   :  { %p590_p10 = por %p589_p9, %p588_p8 }
  0x53   :  { %p591_p11 = pnand %p590_p10, %p584_p7 }
  0x55   :  { %594 = shalt.err (!%p591_p11)
}
  0x56   :  { %70 = dma.hbm_to_vmem [thread:$0]  %s800_s4, 16, %s68_s12, [#allocation10]  }
  0x57   :  { %639 = dma.done.wait [#allocation4], 128  }
  0x58   :  { %640 = vsyncadd [#allocation4], 4294967168 }
  0x59   :  { %641 = dma.done.wait [#allocation7], 2064  }
  0x5a   :  { %642 = vsyncadd [#allocation7], 4294965232 }
  0x5b   :  { %643 = dma.done.wait [#allocation10], 2064  }
  0x5c   :  { %644 = vsyncadd [#allocation10], 4294965232  ;;  %v656_v0 = vmov 0.0|0.0   ;;  %vm657_vm0 = vmmov 0   ;;  %v658_v1 = vmov 0.0   ;;  %v87_v2 = vld [vmem:[#allocation6] sm:$0xff] }
  0x5d   :  { %425 = vmatprep.subr.bf16.mxu0 %v656_v0  ;;  %387 = vmatprep.mubr.msk.f32.mxu0 %vm657_vm0, %v658_v1  ;;  %v88_v3 = vld [vmem:[#allocation6 + $0x8] sm:$0xff]  ;;  %v89_v4 = vld [vmem:[#allocation6 + $0x10] sm:$0xff]  ;;  %v90_v6 = vld [vmem:[#allocation6 + $0x18] sm:$0xff]  ;;  %s659_s4 = smov [#allocation13]  }
  0x5e   :  { %449 = vmatprep.subr.bf16.mxu1 %v656_v0  ;;  %422 = vmatprep.mubr.msk.f32.mxu1 %vm657_vm0, %v658_v1  ;;  %v426_v5 = vpack.c.bf16 %v88_v3, %v87_v2  ;;  %v429_v7 = vpack.c.bf16 %v90_v6, %v89_v4  ;;  %v91_v8 = vld [vmem:[#allocation6 + $0x20] sm:$0xff]  ;;  %v92_v9 = vld [vmem:[#allocation6 + $0x28] sm:$0xff]  ;;  %v197_v12 = vld [vmem:[#allocation9 + $0x10] sm:$0xff]  ;;  %s304_s3 = sshll.u32 %s659_s4, 4  ;;  %s305_s3 = int_to_ptr.vmem [resolvable:$true] %s304_s3 }
  0x5f   :  { %v195_v10 = vld [vmem:[#allocation9] sm:$0xff]  ;;  %v196_v11 = vld [vmem:[#allocation9 + $0x8] sm:$0xff]  ;;  %v198_v13 = vld [vmem:[#allocation9 + $0x18] sm:$0xff]  ;;  %v432_v14 = vpack.c.bf16 %v92_v9, %v91_v8  ;;  %s595_s7 = scalar_lea.vmem %s305_s3, 128  ;;  %p600_p13 = scmp.lt.s32.totalorder %s305_s3, %s305_s3 }
  0x60   :  { %427 = vmatpush3.bf16.msra.mxu0 %v426_v5  ;;  %v450_v15 = vpack.c.bf16 %v196_v11, %v195_v10  ;;  %v93_v16 = vld [vmem:[#allocation6 + $0x30] sm:$0xff]  ;;  %v94_v17 = vld [vmem:[#allocation6 + $0x38] sm:$0xff]  ;;  %v453_v18 = vpack.c.bf16 %v198_v13, %v197_v12  ;;  %v199_v19 = vld [vmem:[#allocation9 + $0x20] sm:$0xff]  ;;  %p596_p12 = scmp.ne.s32.totalorder %s305_s3, %s595_s7  ;;  %p601_p0 = scmp.lt.s32.totalorder %s595_s7, %s595_s7 }
  0x61   :  { %428 = vmatprep.subr.bf16.mxu0 %v656_v0  ;;  %v200_v20 = vld [vmem:[#allocation9 + $0x28] sm:$0xff]  ;;  %v435_v21 = vpack.c.bf16 %v94_v17, %v93_v16  ;;  %v95_v22 = vld [vmem:[#allocation6 + $0x40] sm:$0xff]  ;;  %v201_v25 = vld [vmem:[#allocation9 + $0x30] sm:$0xff] }
  0x62   :  { %451 = vmatpush3.bf16.msra.mxu1 %v450_v15  ;;  %v96_v23 = vld [vmem:[#allocation6 + $0x48] sm:$0xff]  ;;  %v456_v24 = vpack.c.bf16 %v200_v20, %v199_v19  ;;  %v202_v26 = vld [vmem:[#allocation9 + $0x38] sm:$0xff]  ;;  %v97_v28 = vld [vmem:[#allocation6 + $0x50] sm:$0xff]  ;;  %p602_p1 = por %p601_p0, %p600_p13 }
  0x63   :  { %452 = vmatprep.subr.bf16.mxu1 %v656_v0  ;;  %v438_v27 = vpack.c.bf16 %v96_v23, %v95_v22  ;;  %v98_v29 = vld [vmem:[#allocation6 + $0x58] sm:$0xff]  ;;  %v459_v30 = vpack.c.bf16 %v202_v26, %v201_v25  ;;  %v203_v31 = vld [vmem:[#allocation9 + $0x40] sm:$0xff]  ;;  %v204_v32 = vld [vmem:[#allocation9 + $0x48] sm:$0xff] }
  0x64   :  { %430 = vmatpush3.bf16.msra.mxu0 %v429_v7  ;;  %v441_v33 = vpack.c.bf16 %v98_v29, %v97_v28  ;;  %v99_v34 = vld [vmem:[#allocation6 + $0x60] sm:$0xff]  ;;  %v100_v35 = vld [vmem:[#allocation6 + $0x68] sm:$0xff]  ;;  %v462_v36 = vpack.c.bf16 %v204_v32, %v203_v31  ;;  %v205_v37 = vld [vmem:[#allocation9 + $0x50] sm:$0xff]  ;;  %p603_p2 = pnand %p602_p1, %p596_p12 }
  0x65   :  { %431 = vmatprep.subr.bf16.mxu0 %v656_v0  ;;  %v206_v38 = vld [vmem:[#allocation9 + $0x58] sm:$0xff]  ;;  %v444_v39 = vpack.c.bf16 %v100_v35, %v99_v34  ;;  %v101_v40 = vld [vmem:[#allocation6 + $0x70] sm:$0xff]  ;;  %v207_v43 = vld [vmem:[#allocation9 + $0x60] sm:$0xff] }
  0x66   :  { %454 = vmatpush3.bf16.msra.mxu1 %v453_v18  ;;  %v102_v41 = vld [vmem:[#allocation6 + $0x78] sm:$0xff]  ;;  %v465_v42 = vpack.c.bf16 %v206_v38, %v205_v37  ;;  %v208_v44 = vld [vmem:[#allocation9 + $0x68] sm:$0xff]  ;;  %v319_v51 = vld [vmem:[#allocation8] ss:$0 sm:$0xff] }
  0x67   :  { %455 = vmatprep.subr.bf16.mxu1 %v656_v0  ;;  %v447_v45 = vpack.c.bf16 %v102_v41, %v101_v40  ;;  %v468_v46 = vpack.c.bf16 %v208_v44, %v207_v43  ;;  %v86_v47 = vld [vmem:[#allocation3] sm:$0xff] }
  0x68   :  { %433 = vmatpush3.bf16.msra.mxu0 %v432_v14  ;;  %v209_v48 = vld [vmem:[#allocation9 + $0x70] sm:$0xff]  ;;  %v210_v49 = vld [vmem:[#allocation9 + $0x78] sm:$0xff] }
  0x69   :  { %434 = vmatprep.subr.bf16.mxu0 %v656_v0  ;;  %v471_v50 = vpack.c.bf16 %v210_v49, %v209_v48 }
  0x6a   :  { %457 = vmatpush3.bf16.msra.mxu1 %v456_v24 }
  0x6b   :  { %458 = vmatprep.subr.bf16.mxu1 %v656_v0 }
  0x6c   :  { %436 = vmatpush3.bf16.msra.mxu0 %v435_v21 }
  0x6d   :  { %437 = vmatprep.subr.bf16.mxu0 %v656_v0 }
  0x6e   :  { %460 = vmatpush3.bf16.msra.mxu1 %v459_v30 }
  0x6f   :  { %461 = vmatprep.subr.bf16.mxu1 %v656_v0 }
  0x70   :  { %439 = vmatpush3.bf16.msra.mxu0 %v438_v27 }
  0x71   :  { %440 = vmatprep.subr.bf16.mxu0 %v656_v0 }
  0x72   :  { %463 = vmatpush3.bf16.msra.mxu1 %v462_v36 }
  0x73   :  { %464 = vmatprep.subr.bf16.mxu1 %v656_v0 }
  0x74   :  { %442 = vmatpush3.bf16.msra.mxu0 %v441_v33 }
  0x75   :  { %443 = vmatprep.subr.bf16.mxu0 %v656_v0 }
  0x76   :  { %466 = vmatpush3.bf16.msra.mxu1 %v465_v42 }
  0x77   :  { %467 = vmatprep.subr.bf16.mxu1 %v656_v0 }
  0x78   :  { %445 = vmatpush3.bf16.msra.mxu0 %v444_v39 }
  0x79   :  { %446 = vmatprep.subr.bf16.mxu0 %v656_v0 }
  0x7a   :  { %469 = vmatpush3.bf16.msra.mxu1 %v468_v46 }
  0x7b   :  { %470 = vmatprep.subr.bf16.mxu1 %v656_v0 }
  0x7c   :  { %448 = vmatpush3.bf16.msra.mxu0 %v447_v45 }
  0x7e   :  { %472 = vmatpush3.bf16.msra.mxu1 %v471_v50 }
  0x7f   :  { %388 = vmatmul.mubr.f32.vlgmr.msra.gmra.mrb[0].mxu0 %v86_v47 }
 0x152   :  { %v176_v52 = vpop.f32.mrb[0].mxu0 }
 0x153   :  { %v177_v53 = vadd.f32 %v319_v51, %v176_v52  ;;  %v389_v54 = vpop.f32.mrb[1].mxu0 }
 0x155   :  { %v180_v55 = vmax.f32 %v177_v53, 0.0 }
 0x157   :  { %181 = vst [vmem:[#allocation13] sm:$0xff] %v180_v55  ;;  %423 = vmatmul.mubr.f32.vlgmr.msra.gmra.mrb[0].mxu1 %v180_v55 }
 0x158   :  { %606 = shalt.err (!%p603_p2)
}
 0x159   :  { %s607_s11 = scalar_lea.hbm %s802_s6, 128 }
 0x15a   :  { %p608_p3 = scmp.ne.s32.totalorder %s802_s6, %s607_s11  ;;  %p611_p4 = scmp.lt.u32.totalorder %s607_s11, %s802_s6 }
 0x15c   :  { %p613_p5 = pnand %p611_p4, %p608_p3 }
 0x15e   :  { %616 = shalt.err (!%p613_p5)
}
 0x15f   :  { %307 = dma.vmem_to_hbm [thread:$0]  %s305_s3, 128, %s802_s6, [#allocation14]   ;;  %v320_v56 = vld [vmem:[#allocation11] ss:$0 sm:$0xff] }
 0x160   :  { %s660_s19 = smov [#allocation12]  }
 0x161   :  { %s294_s20 = sshll.u32 %s660_s19, 4  ;;  %s295_s20 = int_to_ptr.vmem [resolvable:$true] %s294_s20 }
 0x162   :  { %s617_s0 = scalar_lea.vmem %s295_s20, 128  ;;  %p622_p7 = scmp.lt.s32.totalorder %s295_s20, %s295_s20 }
 0x163   :  { %p618_p6 = scmp.ne.s32.totalorder %s295_s20, %s617_s0  ;;  %p623_p8 = scmp.lt.s32.totalorder %s617_s0, %s617_s0 }
 0x165   :  { %p624_p9 = por %p623_p8, %p622_p7 }
 0x167   :  { %p625_p10 = pnand %p624_p9, %p618_p6 }
 0x22a   :  { %v277_v57 = vpop.f32.mrb[0].mxu1 }
 0x22b   :  { %v281_v58 = vadd.f32 %v320_v56, %v277_v57  ;;  %v424_v59 = vpop.f32.mrb[1].mxu1 }
 0x22d   :  { %287 = vst [vmem:[#allocation12] sm:$0xff] %v281_v58 }
 0x22e   :  { %628 = shalt.err (!%p625_p10)
}
 0x22f   :  { %s629_s1 = scalar_lea.hbm %s801_s5, 128 }
 0x230   :  { %p630_p11 = scmp.ne.s32.totalorder %s801_s5, %s629_s1  ;;  %p633_p12 = scmp.lt.u32.totalorder %s629_s1, %s801_s5 }
 0x232   :  { %p635_p13 = pnand %p633_p12, %p630_p11 }
 0x234   :  { %638 = shalt.err (!%p635_p13)
}
 0x235   :  { %297 = dma.vmem_to_hbm [thread:$0]  %s295_s20, 128, %s801_s5, [#allocation5]  }
 0x236   :  { %645 = dma.done.wait [#allocation5], 128  }
 0x237   :  { %646 = vsyncadd [#allocation5], 4294967168 }
 0x238   :  { %647 = dma.done.wait [#allocation14], 128  }
 0x239   :  { %648 = vsyncadd [#allocation14], 4294967168 }
 0x23a   :  { %314 = vsyncpa [#allocation4], 1 }
 0x23b   :  { %315 = vsyncpa [#allocation7], 1 }
 0x23c   :  { %316 = vsyncpa [#allocation10], 1 }
 0x23d   :  { %317 = vsyncpa [#allocation5], 1 }
 0x23e   :  { %318 = vsyncpa [#allocation14], 1 }

</bundles_post_ra>
